<compile_context>
chip_gen: v7x
topology: tpu7x:2x2x1
jax: 0.10.0
libtpu: 0.0.40
codegen_flags: <defaults>
</compile_context>

<pallas_src>
import functools

import jax
import jax.numpy as jnp
from jax import lax
from jax.experimental import pallas as pl
from jax.experimental.pallas import tpu as pltpu

_LN_EPS = 1e-6


def _round_up(x, m):
    return ((x + m - 1) // m) * m


def _vmem_capacity_bytes():
    """Physical VMEM per TensorCore; conservative (v7x-sized) fallback."""
    try:
        cap = getattr(pltpu.get_tpu_info(), "vmem_capacity_bytes", None)
        if cap:
            return int(cap)
    except Exception:
        pass
    return 64 * 1024 * 1024


def _invariant_spec(shape, index_map):
    """Grid-invariant block: request single buffering when supported."""
    if hasattr(pl, "Buffered"):
        try:
            return pl.BlockSpec(shape, index_map, pipeline_mode=pl.Buffered(1))
        except Exception:
            pass
    return pl.BlockSpec(shape, index_map)


def _pick_batch_tile(batch, per_example_bytes, vmem_cap):
    # Candidates keep the (bt, LP) / (2, bt, SP) blocks sublane-aligned
    # (bt % 8 == 0) or cover the full batch (bt == batch).
    cands = [d for d in range(1, batch + 1)
             if batch % d == 0 and (d == batch or d % 8 == 0)]
    budget = vmem_cap // 4                         # budget for the double-buffered emb tile
    cap = max(1, budget // (2 * per_example_bytes))
    fit = [d for d in cands if d <= cap] or [min(cands)]
    multi = [d for d in fit if batch // d >= 2]    # >=2 grid steps -> v7x megacore split
    pool = multi or fit
    return max(pool)


def _pick_chunk(bt, sp, target_rows=512):
    # Chunk M = 2*cb*sp: bound f32 temporaries while keeping the MXU operand
    # at ~256-512 rows (cannot chunk below one full sequence pair).
    cb = 1
    for d in range(1, bt + 1):
        if bt % d == 0 and 2 * d * sp <= target_rows:
            cb = d
    return cb, bt // cb


def siamese_kernel(emb_ref, segw_ref, pos_ref, gamma_ref, beta_ref,
                   wenc_ref, benc_ref, wcls_ref, bcls_ref,
                   logits_ref, pooled_sc, *, h_real, cb, n_chunks):
    two, bt, sp, hp = emb_ref.shape
    gamma = gamma_ref[...]                       # (1, hp) f32 — hoisted broadcasts
    beta = beta_ref[...]
    benc = benc_ref[...]
    pos = pos_ref[...]                           # (sp, hp) f32, added in-kernel

    if hp != h_real:                             # lane padding active (H < 128 case)
        lane = lax.broadcasted_iota(jnp.int32, (1, hp), 1)
        lane_mask = (lane < h_real).astype(jnp.float32)
    else:
        lane_mask = None
    inv_h = jnp.float32(1.0 / h_real)

    def chunk_body(j, carry):
        start = pl.multiple_of(j * cb, cb)
        # (2, cb, sp, hp) — bounded f32 live range per chunk.
        x = emb_ref[:, pl.ds(start, cb), :, :].astype(jnp.float32) + pos
        mu = jnp.sum(x, axis=-1, keepdims=True) * inv_h
        cen = x - mu
        if lane_mask is not None:
            cen = cen * lane_mask                # zero padded lanes before variance
        var = jnp.sum(cen * cen, axis=-1, keepdims=True) * inv_h   # two-pass variance
        xn = cen * lax.rsqrt(var + _LN_EPS) * gamma + beta

        # One bf16 [2*cb*sp, hp] x [hp, hp] MXU matmul per chunk (f32 accumulate).
        x2d = xn.reshape(2 * cb * sp, hp).astype(jnp.bfloat16)
        henc = jnp.dot(x2d, wenc_ref[...], preferred_element_type=jnp.float32)
        hact = jnp.tanh(henc + benc)             # EUP tanh, f32
        bank = hact.reshape(2, cb, sp, hp)

        # Masked-mean pooling (weights pre-normalized in the wrapper).
        sw = segw_ref[:, pl.ds(start, cb), :]    # (2, cb, sp)
        pooled = jnp.sum(bank * sw[..., None], axis=2)            # (2, cb, hp)
        pooled_sc[:, pl.ds(start, cb), :] = pooled
        return carry

    lax.fori_loop(0, n_chunks, chunk_body, 0, unroll=(n_chunks <= 8))

    pooled = pooled_sc[...]                      # (2, bt, hp)
    f0 = pooled[0]
    f1 = pooled[1]
    d = jnp.abs(f0 - f1)
    p = f0 * f1
    # classifier([f0, f1, |f0-f1|, f0*f1]) as four accumulated dots (no concat copy).
    logits = (
        jnp.dot(f0.astype(jnp.bfloat16), wcls_ref[0], preferred_element_type=jnp.float32)
        + jnp.dot(f1.astype(jnp.bfloat16), wcls_ref[1], preferred_element_type=jnp.float32)
        + jnp.dot(d.astype(jnp.bfloat16), wcls_ref[2], preferred_element_type=jnp.float32)
        + jnp.dot(p.astype(jnp.bfloat16), wcls_ref[3], preferred_element_type=jnp.float32)
        + bcls_ref[...]
    )
    logits_ref[...] = logits                     # (bt, LP) f32, lane-dense store


def siamese_classifier_forward(src0, src1, seg0, seg1, tgt, params,
                               batch_tile=None):
    """JAX wrapper: embedding gather (glue) + fused, batch-tiled Pallas head."""
    word_emb = params["word_emb"]                # [V, H]
    pos_emb = params["pos_emb"]                  # [S, H]
    B, S = src0.shape
    V, H = word_emb.shape
    L = params["b_cls"].shape[-1]

    HP = max(_round_up(H, 128), 128)             # lane-dense hidden
    SP = max(_round_up(S, 8), 8)                 # sublane-aligned seq (reshape stays a no-op)
    LP = max(_round_up(L, 128), 128)             # lane-dense logits

    # ---- zero-pad parameters (padding is inert: gamma/beta/w rows/cols are 0) ----
    word_emb_p = jnp.zeros((V, HP), jnp.float32).at[:, :H].set(word_emb)
    pos_p = jnp.zeros((SP, HP), jnp.float32).at[:S, :H].set(pos_emb)
    gamma_p = jnp.zeros((1, HP), jnp.float32).at[:, :H].set(params["ln_gamma"])
    beta_p = jnp.zeros((1, HP), jnp.float32).at[:, :H].set(params["ln_beta"])
    w_enc_p = (jnp.zeros((HP, HP), jnp.float32).at[:H, :H]
               .set(params["w_enc"]).astype(jnp.bfloat16))
    b_enc_p = jnp.zeros((1, HP), jnp.float32).at[:, :H].set(params["b_enc"])
    w_cls4 = params["w_cls"].reshape(4, H, L)
    w_cls_p = (jnp.zeros((4, HP, LP), jnp.float32).at[:, :H, :L]
               .set(w_cls4).astype(jnp.bfloat16))
    b_cls_p = jnp.zeros((1, LP), jnp.float32).at[:, :L].set(params["b_cls"])

    # ---- embedding gather (JAX glue); pos_emb is added inside the kernel -------
    # TODO(synk): fuse the word-embedding row gather into the kernel (scalar-
    #             prefetched token ids + manual HBM row DMA) to remove this
    #             (2,B,SP,HP) HBM write+read round-trip (largest HBM cost on v5e).
    def pad_tok(s):
        return jnp.pad(s, ((0, 0), (0, SP - S)))
    emb0 = word_emb_p[pad_tok(src0)].astype(jnp.bfloat16)        # (B, SP, HP)
    emb1 = word_emb_p[pad_tok(src1)].astype(jnp.bfloat16)
    emb = jnp.stack([emb0, emb1], axis=0)                        # (2, B, SP, HP)

    # Masked-mean pooling weights: seg / clamp(count, 1); padded positions -> 0.
    seg = jnp.stack([pad_tok(seg0), pad_tok(seg1)], axis=0).astype(jnp.float32)
    cnt = jnp.maximum(jnp.sum(seg, axis=2, keepdims=True), 1.0)
    segw = seg / cnt                                             # (2, B, SP)

    vmem_cap = _vmem_capacity_bytes()
    per_ex_bytes = 2 * SP * HP * 2                               # both branches, bf16
    if batch_tile is None:
        batch_tile = _pick_batch_tile(B, per_ex_bytes, vmem_cap)
    bt = batch_tile
    assert B % bt == 0 and (bt == B or bt % 8 == 0), "bad batch tile"
    grid = (B // bt,)
    cb, n_chunks = _pick_chunk(bt, SP)

    kernel = functools.partial(siamese_kernel, h_real=H, cb=cb, n_chunks=n_chunks)

    flops = 2 * (2 * B * SP * HP * HP) + 4 * (2 * B * HP * LP)
    transcendentals = 2 * B * SP * HP + 2 * B * SP
    bytes_accessed = int(emb.size * 2 + segw.size * 4 + pos_p.size * 4
                         + (3 * HP + LP) * 4 + HP * HP * 2 + 4 * HP * LP * 2
                         + B * LP * 4)
    cost = pl.CostEstimate(flops=int(flops), transcendentals=int(transcendentals),
                           bytes_accessed=bytes_accessed)

    logits_p = pl.pallas_call(
        kernel,
        out_shape=jax.ShapeDtypeStruct((B, LP), jnp.float32),
        grid=grid,
        in_specs=[
            pl.BlockSpec((2, bt, SP, HP), lambda i: (0, i, 0, 0)),   # emb (bf16)
            pl.BlockSpec((2, bt, SP), lambda i: (0, i, 0)),          # pooling wts
            _invariant_spec((SP, HP), lambda i: (0, 0)),             # pos_emb
            _invariant_spec((1, HP), lambda i: (0, 0)),              # ln_gamma
            _invariant_spec((1, HP), lambda i: (0, 0)),              # ln_beta
            _invariant_spec((HP, HP), lambda i: (0, 0)),             # w_enc (bf16)
            _invariant_spec((1, HP), lambda i: (0, 0)),              # b_enc
            _invariant_spec((4, HP, LP), lambda i: (0, 0, 0)),       # w_cls (bf16)
            _invariant_spec((1, LP), lambda i: (0, 0)),              # b_cls
        ],
        out_specs=pl.BlockSpec((bt, LP), lambda i: (i, 0)),
        scratch_shapes=[pltpu.VMEM((2, bt, HP), jnp.float32)],       # pooled features
        compiler_params=pltpu.CompilerParams(
            dimension_semantics=("parallel",),
            vmem_limit_bytes=min(int(vmem_cap * 3 // 4), 96 * 1024 * 1024)),
        cost_estimate=cost,
    )(emb, segw, pos_p, gamma_p, beta_p, w_enc_p, b_enc_p, w_cls_p, b_cls_p)

    logits = logits_p[:, :L]
    # Loss tail in the wrapper (drops the onehot input + NLL output DMA streams).
    logp = jax.nn.log_softmax(logits, axis=-1)
    loss = -jnp.mean(logp[jnp.arange(B), tgt])
    return loss, logits


def reference_forward(src0, src1, seg0, seg1, tgt, params):
    """Pure-JAX reference mirroring the PyTorch semantics (and the kernel's
    bf16-operand / f32-accumulate matmul recipe) for validation."""
    word_emb, pos_emb = params["word_emb"], params["pos_emb"]

    def branch(src, seg):
        emb = word_emb[src].astype(jnp.bfloat16).astype(jnp.float32) + pos_emb[None]
        mu = jnp.mean(emb, axis=-1, keepdims=True)
        var = jnp.mean((emb - mu) ** 2, axis=-1, keepdims=True)
        xn = (params["ln_gamma"] * (emb - mu) / jnp.sqrt(var + _LN_EPS)
              + params["ln_beta"])
        h = jnp.einsum("bsh,hk->bsk", xn.astype(jnp.bfloat16),
                       params["w_enc"].astype(jnp.bfloat16),
                       preferred_element_type=jnp.float32) + params["b_enc"]
        h = jnp.tanh(h)
        segf = seg.astype(jnp.float32)[..., None]
        cnt = jnp.maximum(jnp.sum(segf, axis=1), 1.0)
        return jnp.sum(h * segf, axis=1) / cnt

    f0 = branch(src0, seg0)
    f1 = branch(src1, seg1)
    feats = jnp.concatenate([f0, f1, jnp.abs(f0 - f1), f0 * f1], axis=1)
    logits = jnp.dot(feats.astype(jnp.bfloat16),
                     params["w_cls"].astype(jnp.bfloat16),
                     preferred_element_type=jnp.float32) + params["b_cls"]
    logp = jax.nn.log_softmax(logits, axis=-1)
    loss = -jnp.mean(logp[jnp.arange(logits.shape[0]), tgt])
    return loss, logits


if __name__ == "__main__":
    B, S, H, V, L = 2, 8, 32, 64, 8   # batch, seq, hidden, vocab, labels_num

    key = jax.random.PRNGKey(0)
    keys = jax.random.split(key, 8)

    params = {
        "word_emb": 0.02 * jax.random.normal(keys[0], (V, H), jnp.float32),
        "pos_emb":  0.02 * jax.random.normal(keys[1], (S, H), jnp.float32),
        "ln_gamma": jnp.ones((1, H), jnp.float32),
        "ln_beta":  jnp.zeros((1, H), jnp.float32),
        "w_enc":    0.1 * jax.random.normal(keys[2], (H, H), jnp.float32),
        "b_enc":    jnp.zeros((1, H), jnp.float32),
        # classifier: nn.Linear(4 * hidden_size, labels_num)
        "w_cls":    0.1 * jax.random.normal(keys[3], (4 * H, L), jnp.float32),
        "b_cls":    0.01 * jax.random.normal(keys[4], (1, L), jnp.float32),
    }

    src0 = jax.random.randint(keys[5], (B, S), 0, V, jnp.int32)
    src1 = jax.random.randint(keys[6], (B, S), 0, V, jnp.int32)
    # segment masks with padding (1 = real token, 0 = pad); sums > 0
    seg0 = jnp.array([[1, 1, 1, 1, 1, 0, 0, 0],
                      [1, 1, 1, 0, 0, 0, 0, 0]], jnp.int32)
    seg1 = jnp.array([[1, 1, 1, 1, 0, 0, 0, 0],
                      [1, 1, 1, 1, 1, 1, 0, 0]], jnp.int32)
    tgt = jax.random.randint(keys[7], (B,), 0, L, jnp.int32)

    loss, logits = jax.jit(siamese_classifier_forward)(
        src0, src1, seg0, seg1, tgt, params)
    jax.block_until_ready((loss, logits))

    ref_loss, ref_logits = reference_forward(src0, src1, seg0, seg1, tgt, params)
    assert jnp.allclose(logits, ref_logits, rtol=2e-3, atol=2e-3), "logits mismatch"
    assert jnp.allclose(loss, ref_loss, rtol=2e-3, atol=2e-3), "loss mismatch"

    print("KERNEL_OK")
</pallas_src>

<mosaic_0001>
module attributes {stable_mosaic.version = 11 : i64} {
  func.func @siamese_kernel(%arg0: i32, %arg1: memref<2x2x8x128xbf16, #tpu.memory_space<vmem>>, %arg2: memref<2x2x8xf32, #tpu.memory_space<vmem>>, %arg3: memref<8x128xf32, #tpu.memory_space<vmem>>, %arg4: memref<1x128xf32, #tpu.memory_space<vmem>>, %arg5: memref<1x128xf32, #tpu.memory_space<vmem>>, %arg6: memref<128x128xbf16, #tpu.memory_space<vmem>>, %arg7: memref<1x128xf32, #tpu.memory_space<vmem>>, %arg8: memref<4x128x128xbf16, #tpu.memory_space<vmem>>, %arg9: memref<1x128xf32, #tpu.memory_space<vmem>>, %arg10: memref<2x128xf32, #tpu.memory_space<vmem>>, %arg11: memref<2x2x128xf32, #tpu.memory_space<vmem>>) attributes {dimension_semantics = [#tpu.dimension_semantics<parallel>], iteration_bounds = array<i64: 1>, scalar_prefetch = 0 : i64, scratch_operands = 1 : i64, tpu.core_type = #tpu.core_type<tc>, window_params = [{transform_indices = @transform_0, window_bounds = array<i64: 2, 2, 8, 128>}, {transform_indices = @transform_1, window_bounds = array<i64: 2, 2, 8>}, {pipeline_mode = #tpu.pipeline_mode<synchronous>, transform_indices = @transform_2, window_bounds = array<i64: 8, 128>}, {pipeline_mode = #tpu.pipeline_mode<synchronous>, transform_indices = @transform_3, window_bounds = array<i64: 1, 128>}, {pipeline_mode = #tpu.pipeline_mode<synchronous>, transform_indices = @transform_4, window_bounds = array<i64: 1, 128>}, {pipeline_mode = #tpu.pipeline_mode<synchronous>, transform_indices = @transform_5, window_bounds = array<i64: 128, 128>}, {pipeline_mode = #tpu.pipeline_mode<synchronous>, transform_indices = @transform_6, window_bounds = array<i64: 1, 128>}, {pipeline_mode = #tpu.pipeline_mode<synchronous>, transform_indices = @transform_7, window_bounds = array<i64: 4, 128, 128>}, {pipeline_mode = #tpu.pipeline_mode<synchronous>, transform_indices = @transform_8, window_bounds = array<i64: 1, 128>}, {transform_indices = @transform_9, window_bounds = array<i64: 2, 128>}]} {
    %c0 = arith.constant 0 : index
    %c0_0 = arith.constant 0 : index
    %0 = vector.load %arg4[%c0, %c0_0] : memref<1x128xf32, #tpu.memory_space<vmem>>, vector<1x128xf32>
    %c0_1 = arith.constant 0 : index
    %c0_2 = arith.constant 0 : index
    %1 = vector.load %arg5[%c0_1, %c0_2] : memref<1x128xf32, #tpu.memory_space<vmem>>, vector<1x128xf32>
    %c0_3 = arith.constant 0 : index
    %c0_4 = arith.constant 0 : index
    %2 = vector.load %arg7[%c0_3, %c0_4] : memref<1x128xf32, #tpu.memory_space<vmem>>, vector<1x128xf32>
    %c0_5 = arith.constant 0 : index
    %c0_6 = arith.constant 0 : index
    %3 = vector.load %arg3[%c0_5, %c0_6] : memref<8x128xf32, #tpu.memory_space<vmem>>, vector<8x128xf32>
    %4 = tpu.iota {dimensions = array<i32: 1>} : vector<1x128xi32>
    %c32_i32 = arith.constant 32 : i32
    %5 = vector.broadcast %c32_i32 : i32 to vector<1x128xi32>
    %6 = arith.cmpi slt, %4, %5 : vector<1x128xi32>
    %7 = arith.extui %6 : vector<1x128xi1> to vector<1x128xi32>
    %8 = arith.sitofp %7 : vector<1x128xi32> to vector<1x128xf32>
    %cst = arith.constant 3.125000e-02 : f32
    %c0_i32 = arith.constant 0 : i32
    %c2_i32 = arith.constant 2 : i32
    %9 = arith.muli %c0_i32, %c2_i32 : i32
    %10 = tpu.assume_multiple %9, 2 : i32
    %c0_7 = arith.constant 0 : index
    %11 = arith.index_cast %10 : i32 to index
    %c0_8 = arith.constant 0 : index
    %c0_9 = arith.constant 0 : index
    %12 = vector.load %arg1[%c0_7, %11, %c0_8, %c0_9] : memref<2x2x8x128xbf16, #tpu.memory_space<vmem>>, vector<2x2x8x128xbf16>
    %13 = arith.extf %12 : vector<2x2x8x128xbf16> to vector<2x2x8x128xf32>
    %14 = vector.shape_cast %3 : vector<8x128xf32> to vector<1x1x8x128xf32>
    %15 = vector.broadcast %14 : vector<1x1x8x128xf32> to vector<2x2x8x128xf32>
    %16 = arith.addf %13, %15 : vector<2x2x8x128xf32>
    %cst_10 = arith.constant dense<0.000000e+00> : vector<2x2x8xf32>
    %17 = vector.multi_reduction <add>, %16, %cst_10 [3] : vector<2x2x8x128xf32> to vector<2x2x8xf32>
    %18 = vector.shape_cast %17 : vector<2x2x8xf32> to vector<2x2x8x1xf32>
    %19 = vector.broadcast %cst : f32 to vector<2x2x8x1xf32>
    %20 = arith.mulf %18, %19 : vector<2x2x8x1xf32>
    %21 = vector.broadcast %20 : vector<2x2x8x1xf32> to vector<2x2x8x128xf32>
    %22 = arith.subf %16, %21 : vector<2x2x8x128xf32>
    %23 = vector.shape_cast %8 : vector<1x128xf32> to vector<1x1x1x128xf32>
    %24 = vector.broadcast %23 : vector<1x1x1x128xf32> to vector<2x2x8x128xf32>
    %25 = arith.mulf %22, %24 : vector<2x2x8x128xf32>
    %26 = arith.mulf %25, %25 : vector<2x2x8x128xf32>
    %cst_11 = arith.constant dense<0.000000e+00> : vector<2x2x8xf32>
    %27 = vector.multi_reduction <add>, %26, %cst_11 [3] : vector<2x2x8x128xf32> to vector<2x2x8xf32>
    %28 = vector.shape_cast %27 : vector<2x2x8xf32> to vector<2x2x8x1xf32>
    %29 = vector.broadcast %cst : f32 to vector<2x2x8x1xf32>
    %30 = arith.mulf %28, %29 : vector<2x2x8x1xf32>
    %cst_12 = arith.constant 9.99999997E-7 : f32
    %31 = vector.broadcast %cst_12 : f32 to vector<2x2x8x1xf32>
    %32 = arith.addf %30, %31 : vector<2x2x8x1xf32>
    %33 = math.rsqrt %32 : vector<2x2x8x1xf32>
    %34 = vector.broadcast %33 : vector<2x2x8x1xf32> to vector<2x2x8x128xf32>
    %35 = arith.mulf %25, %34 : vector<2x2x8x128xf32>
    %36 = vector.shape_cast %0 : vector<1x128xf32> to vector<1x1x1x128xf32>
    %37 = vector.broadcast %36 : vector<1x1x1x128xf32> to vector<2x2x8x128xf32>
    %38 = arith.mulf %35, %37 : vector<2x2x8x128xf32>
    %39 = vector.shape_cast %1 : vector<1x128xf32> to vector<1x1x1x128xf32>
    %40 = vector.broadcast %39 : vector<1x1x1x128xf32> to vector<2x2x8x128xf32>
    %41 = arith.addf %38, %40 : vector<2x2x8x128xf32>
    %42 = vector.shape_cast %41 : vector<2x2x8x128xf32> to vector<32x128xf32>
    %43 = arith.truncf %42 : vector<32x128xf32> to vector<32x128xbf16>
    %c0_13 = arith.constant 0 : index
    %c0_14 = arith.constant 0 : index
    %44 = vector.load %arg6[%c0_13, %c0_14] : memref<128x128xbf16, #tpu.memory_space<vmem>>, vector<128x128xbf16>
    %cst_15 = arith.constant dense<0.000000e+00> : vector<32x128xf32>
    %45 = tpu.matmul %43, %44, %cst_15 {dimension_numbers = #tpu.dot_dimension_numbers<[1], [0], [0], [1], [0, 0, 1, 1], [], []>} : vector<32x128xbf16>, vector<128x128xbf16>, vector<32x128xf32> -> vector<32x128xf32>
    %46 = vector.broadcast %2 : vector<1x128xf32> to vector<32x128xf32>
    %47 = arith.addf %45, %46 : vector<32x128xf32>
    %48 = math.tanh %47 : vector<32x128xf32>
    %49 = vector.shape_cast %48 : vector<32x128xf32> to vector<2x2x8x128xf32>
    %c0_16 = arith.constant 0 : index
    %50 = arith.index_cast %10 : i32 to index
    %c0_17 = arith.constant 0 : index
    %51 = vector.load %arg2[%c0_16, %50, %c0_17] : memref<2x2x8xf32, #tpu.memory_space<vmem>>, vector<2x2x8xf32>
    %52 = vector.shape_cast %51 : vector<2x2x8xf32> to vector<2x2x8x1xf32>
    %53 = vector.broadcast %52 : vector<2x2x8x1xf32> to vector<2x2x8x128xf32>
    %54 = arith.mulf %49, %53 : vector<2x2x8x128xf32>
    %cst_18 = arith.constant dense<0.000000e+00> : vector<2x2x128xf32>
    %55 = vector.multi_reduction <add>, %54, %cst_18 [2] : vector<2x2x8x128xf32> to vector<2x2x128xf32>
    %c0_19 = arith.constant 0 : index
    %56 = arith.index_cast %10 : i32 to index
    %c0_20 = arith.constant 0 : index
    %57 = vector.load %arg11[%c0_19, %56, %c0_20] : memref<2x2x128xf32, #tpu.memory_space<vmem>>, vector<2x2x128xf32>
    tpu.vector_store %arg11[%c0_19, %56, %c0_20], %55 {strides = array<i32>} : memref<2x2x128xf32, #tpu.memory_space<vmem>>, vector<2x2x128xf32>,
    %c1_i32 = arith.constant 1 : i32
    %c0_21 = arith.constant 0 : index
    %c0_22 = arith.constant 0 : index
    %c0_23 = arith.constant 0 : index
    %58 = vector.load %arg11[%c0_21, %c0_22, %c0_23] : memref<2x2x128xf32, #tpu.memory_space<vmem>>, vector<2x2x128xf32>
    %59 = vector.extract_strided_slice %58 {offsets = [0, 0, 0], sizes = [1, 2, 128], strides = [1, 1, 1]} : vector<2x2x128xf32> to vector<1x2x128xf32>
    %60 = vector.shape_cast %59 : vector<1x2x128xf32> to vector<2x128xf32>
    %61 = vector.extract_strided_slice %58 {offsets = [1, 0, 0], sizes = [1, 2, 128], strides = [1, 1, 1]} : vector<2x2x128xf32> to vector<1x2x128xf32>
    %62 = vector.shape_cast %61 : vector<1x2x128xf32> to vector<2x128xf32>
    %63 = arith.subf %60, %62 : vector<2x128xf32>
    %64 = math.absf %63 : vector<2x128xf32>
    %65 = arith.mulf %60, %62 : vector<2x128xf32>
    %66 = arith.truncf %60 : vector<2x128xf32> to vector<2x128xbf16>
    %c0_24 = arith.constant 0 : index
    %c0_25 = arith.constant 0 : index
    %c0_26 = arith.constant 0 : index
    %67 = vector.load %arg8[%c0_24, %c0_25, %c0_26] : memref<4x128x128xbf16, #tpu.memory_space<vmem>>, vector<1x128x128xbf16>
    %68 = vector.shape_cast %67 : vector<1x128x128xbf16> to vector<128x128xbf16>
    %cst_27 = arith.constant dense<0.000000e+00> : vector<2x128xf32>
    %69 = tpu.matmul %66, %68, %cst_27 {dimension_numbers = #tpu.dot_dimension_numbers<[1], [0], [0], [1], [0, 0, 1, 1], [], []>} : vector<2x128xbf16>, vector<128x128xbf16>, vector<2x128xf32> -> vector<2x128xf32>
    %70 = arith.truncf %62 : vector<2x128xf32> to vector<2x128xbf16>
    %c1 = arith.constant 1 : index
    %c0_28 = arith.constant 0 : index
    %c0_29 = arith.constant 0 : index
    %71 = vector.load %arg8[%c1, %c0_28, %c0_29] : memref<4x128x128xbf16, #tpu.memory_space<vmem>>, vector<1x128x128xbf16>
    %72 = vector.shape_cast %71 : vector<1x128x128xbf16> to vector<128x128xbf16>
    %cst_30 = arith.constant dense<0.000000e+00> : vector<2x128xf32>
    %73 = tpu.matmul %70, %72, %cst_30 {dimension_numbers = #tpu.dot_dimension_numbers<[1], [0], [0], [1], [0, 0, 1, 1], [], []>} : vector<2x128xbf16>, vector<128x128xbf16>, vector<2x128xf32> -> vector<2x128xf32>
    %74 = arith.addf %69, %73 : vector<2x128xf32>
    %75 = arith.truncf %64 : vector<2x128xf32> to vector<2x128xbf16>
    %c2 = arith.constant 2 : index
    %c0_31 = arith.constant 0 : index
    %c0_32 = arith.constant 0 : index
    %76 = vector.load %arg8[%c2, %c0_31, %c0_32] : memref<4x128x128xbf16, #tpu.memory_space<vmem>>, vector<1x128x128xbf16>
    %77 = vector.shape_cast %76 : vector<1x128x128xbf16> to vector<128x128xbf16>
    %cst_33 = arith.constant dense<0.000000e+00> : vector<2x128xf32>
    %78 = tpu.matmul %75, %77, %cst_33 {dimension_numbers = #tpu.dot_dimension_numbers<[1], [0], [0], [1], [0, 0, 1, 1], [], []>} : vector<2x128xbf16>, vector<128x128xbf16>, vector<2x128xf32> -> vector<2x128xf32>
    %79 = arith.addf %74, %78 : vector<2x128xf32>
    %80 = arith.truncf %65 : vector<2x128xf32> to vector<2x128xbf16>
    %c3 = arith.constant 3 : index
    %c0_34 = arith.constant 0 : index
    %c0_35 = arith.constant 0 : index
    %81 = vector.load %arg8[%c3, %c0_34, %c0_35] : memref<4x128x128xbf16, #tpu.memory_space<vmem>>, vector<1x128x128xbf16>
    %82 = vector.shape_cast %81 : vector<1x128x128xbf16> to vector<128x128xbf16>
    %cst_36 = arith.constant dense<0.000000e+00> : vector<2x128xf32>
    %83 = tpu.matmul %80, %82, %cst_36 {dimension_numbers = #tpu.dot_dimension_numbers<[1], [0], [0], [1], [0, 0, 1, 1], [], []>} : vector<2x128xbf16>, vector<128x128xbf16>, vector<2x128xf32> -> vector<2x128xf32>
    %84 = arith.addf %79, %83 : vector<2x128xf32>
    %c0_37 = arith.constant 0 : index
    %c0_38 = arith.constant 0 : index
    %85 = vector.load %arg9[%c0_37, %c0_38] : memref<1x128xf32, #tpu.memory_space<vmem>>, vector<1x128xf32>
    %86 = vector.broadcast %85 : vector<1x128xf32> to vector<2x128xf32>
    %87 = arith.addf %84, %86 : vector<2x128xf32>
    %c0_39 = arith.constant 0 : index
    %c0_40 = arith.constant 0 : index
    %88 = vector.load %arg10[%c0_39, %c0_40] : memref<2x128xf32, #tpu.memory_space<vmem>>, vector<2x128xf32>
    tpu.vector_store %arg10[%c0_39, %c0_40], %87 {strides = array<i32>} : memref<2x128xf32, #tpu.memory_space<vmem>>, vector<2x128xf32>,
    return
  }
  func.func @transform_0(%arg0: i32) -> (i32, i32, i32, i32) {
    %c0_i32 = arith.constant 0 : i32
    %c0_i32_0 = arith.constant 0 : i32
    %c0_i32_1 = arith.constant 0 : i32
    %c0_i32_2 = arith.constant 0 : i32
    return %c0_i32, %arg0, %c0_i32_0, %c0_i32_1 : i32, i32, i32, i32
  }
  func.func @transform_1(%arg0: i32) -> (i32, i32, i32) {
    %c0_i32 = arith.constant 0 : i32
    %c0_i32_0 = arith.constant 0 : i32
    %c0_i32_1 = arith.constant 0 : i32
    return %c0_i32, %arg0, %c0_i32_0 : i32, i32, i32
  }
  func.func @transform_2(%arg0: i32) -> (i32, i32) {
    %c0_i32 = arith.constant 0 : i32
    %c0_i32_0 = arith.constant 0 : i32
    %c0_i32_1 = arith.constant 0 : i32
    return %c0_i32, %c0_i32_0 : i32, i32
  }
  func.func @transform_3(%arg0: i32) -> (i32, i32) {
    %c0_i32 = arith.constant 0 : i32
    %c0_i32_0 = arith.constant 0 : i32
    %c0_i32_1 = arith.constant 0 : i32
    return %c0_i32, %c0_i32_0 : i32, i32
  }
  func.func @transform_4(%arg0: i32) -> (i32, i32) {
    %c0_i32 = arith.constant 0 : i32
    %c0_i32_0 = arith.constant 0 : i32
    %c0_i32_1 = arith.constant 0 : i32
    return %c0_i32, %c0_i32_0 : i32, i32
  }
  func.func @transform_5(%arg0: i32) -> (i32, i32) {
    %c0_i32 = arith.constant 0 : i32
    %c0_i32_0 = arith.constant 0 : i32
    %c0_i32_1 = arith.constant 0 : i32
    return %c0_i32, %c0_i32_0 : i32, i32
  }
  func.func @transform_6(%arg0: i32) -> (i32, i32) {
    %c0_i32 = arith.constant 0 : i32
    %c0_i32_0 = arith.constant 0 : i32
    %c0_i32_1 = arith.constant 0 : i32
    return %c0_i32, %c0_i32_0 : i32, i32
  }
  func.func @transform_7(%arg0: i32) -> (i32, i32, i32) {
    %c0_i32 = arith.constant 0 : i32
    %c0_i32_0 = arith.constant 0 : i32
    %c0_i32_1 = arith.constant 0 : i32
    %c0_i32_2 = arith.constant 0 : i32
    return %c0_i32, %c0_i32_0, %c0_i32_1 : i32, i32, i32
  }
  func.func @transform_8(%arg0: i32) -> (i32, i32) {
    %c0_i32 = arith.constant 0 : i32
    %c0_i32_0 = arith.constant 0 : i32
    %c0_i32_1 = arith.constant 0 : i32
    return %c0_i32, %c0_i32_0 : i32, i32
  }
  func.func @transform_9(%arg0: i32) -> (i32, i32) {
    %c0_i32 = arith.constant 0 : i32
    %c0_i32_0 = arith.constant 0 : i32
    return %arg0, %c0_i32 : i32, i32
  }
}

</mosaic_0001>

<bundles_post_ra>
// kernel: siamese_classifier_forward.1
= control target key start
LH: loop header
LB: loop body
LE: loop exit
PB: predicated region body
PF: predicated region fallthrough
CT: control target
= control target key end

     0   :  { %v1065_v11 = vmov 0.0   ;;  %v37_v13 = vlaneseq  ;;  %vm1066_vm1 = vmmov 0   ;;  %vm309_vm2 = vcmask 1041409   ;;  %s1328_s0 = inlined_call_operand.vmem [shape: bf16[2,2,8,128], index: 0, kind: input, shape index: {}]   ;;  %s1329_s2 = inlined_call_operand.vmem [shape: f32[8,128], index: 2, kind: input, shape index: {}]   ;;  %s1330_s5 = inlined_call_operand.vmem [shape: bf16[128,128], index: 5, kind: input, shape index: {}]   ;;  %s1331_s1 = inlined_call_operand.vmem [shape: f32[2,2,8], index: 1, kind: input, shape index: {}]   ;;  %s1332_s3 = inlined_call_operand.vmem [shape: f32[1,128], index: 3, kind: input, shape index: {}]   ;;  %s1333_s4 = inlined_call_operand.vmem [shape: f32[1,128], index: 4, kind: input, shape index: {}]   ;;  %s1334_s7 = inlined_call_operand.vmem [shape: bf16[4,128,128], index: 7, kind: input, shape index: {}]   ;;  %s1335_s6 = inlined_call_operand.vmem [shape: f32[1,128], index: 6, kind: input, shape index: {}]   ;;  %s1336_s8 = inlined_call_operand.vmem [shape: f32[1,128], index: 8, kind: input, shape index: {}]   ;;  %s1337_s9 = inlined_call_operand.vmem [shape: f32[2,128], index: 9, kind: output, shape index: {}]  }
   0x1   :  { %v36_v0 = vld [vmem:[%s1329_s2] sm:$0xff]  ;;  %v860_v2 = vld [vmem:[%s1328_s0 + $0x8] sm:$0xff]   ;;  %927 = vmatprep.subr.bf16.mxu1 %v1065_v11  ;;  %v1011_v37 = vld [vmem:[%s1330_s5 + $0x10] sm:$0xff]   ;;  %943 = vmatprep.mubr.msk.bf16.mxu1 %vm1066_vm1, %v1065_v11 }
   0x2   :  { %v853_v1 = vld [vmem:[%s1328_s0] sm:$0xff]   ;;  %v858_v4 = vunpack.c.l.bf16 %v860_v2  ;;  %v859_v6 = vunpack.c.h.bf16 %v860_v2  ;;  %v38_v14 = vand.u32 127, %v37_v13  ;;  %v1010_v36 = vld [vmem:[%s1330_s5 + $0x8] sm:$0xff]   ;;  %v1012_v38 = vld [vmem:[%s1330_s5 + $0x18] sm:$0xff]   ;;  %v250_v43 = vshrl.u32 %v37_v13, 7 }
   0x3   :  { %v854_v3 = vunpack.c.l.bf16 %v853_v1  ;;  %v855_v5 = vunpack.c.h.bf16 %v853_v1  ;;  %v1009_v12 = vld [vmem:[%s1330_s5] sm:$0xff]   ;;  %v1014_v40 = vld [vmem:[%s1330_s5 + $0x28] sm:$0xff]   ;;  %v1015_v41 = vld [vmem:[%s1330_s5 + $0x30] sm:$0xff]  }
   0x4   :  { %v52_v8 = vadd.f32 %v858_v4, %v36_v0  ;;  %v53_v10 = vadd.f32 %v859_v6, %v36_v0  ;;  %907 = vmatprep.subr.bf16.mxu0 %v1009_v12  ;;  %vm39_vm0 = vcmp.lt.s32.totalorder %v38_v14, 32  ;;  %v1013_v39 = vld [vmem:[%s1330_s5 + $0x20] sm:$0xff]   ;;  %v1016_v42 = vld [vmem:[%s1330_s5 + $0x38] sm:$0xff]   ;;  %v258_v45 = vsub.s32 1, %v250_v43 }
   0x5   :  { %v50_v7 = vadd.f32 %v854_v3, %v36_v0  ;;  %v51_v9 = vadd.f32 %v855_v5, %v36_v0  ;;  %908 = vmatpush3.bf16.msra.mxu0 %v1009_v12  ;;  %v759_v19 = vsel %vm39_vm0, 1.0, %v1065_v11  ;;  %v248_v44 = vld [vmem:[%s1331_s1 + $0x2] sm:$0x3]  ;;  %v251_v46 = vsub.s32 0, %v250_v43  ;;  %v247_v47 = vld [vmem:[%s1331_s1] sm:$0x3] }
   0x6   :  { %58 = vadd.xlane.f32.xlu1 %v52_v8  ;;  %909 = vmatprep.subr.bf16.mxu0 %v1010_v36  ;;  %v273_v48 = vrot.slane %v248_v44, %v258_v45  ;;  %v259_v51 = vrot.slane %v247_v47, %v258_v45  ;;  %v760_v2 = vld [vmem:[%s1332_s3] ss:$0 sm:$0xff] }
   0x7   :  { %54 = vadd.xlane.f32.xlu0 %v50_v7  ;;  %v266_v49 = vrot.slane %v248_v44, %v251_v46  ;;  %v252_v50 = vrot.slane %v247_v47, %v251_v46 }
   0x9   :  { %910 = vmatpush3.bf16.msra.mxu0 %v1010_v36  ;;  %v1032_v36 = vld [vmem:[%s1334_s7 + $0x38] sm:$0xff]  }
   0xa   :  { %60 = vadd.xlane.f32.xlu1 %v53_v10  ;;  %911 = vmatprep.subr.bf16.mxu0 %v1011_v37 }
   0xb   :  { %56 = vadd.xlane.f32.xlu0 %v51_v9 }
   0xd   :  { %912 = vmatpush3.bf16.msra.mxu0 %v1011_v37  ;;  %v762_v37 = vld [vmem:[%s1335_s6] ss:$0 sm:$0xff] }
   0xe   :  { %913 = vmatprep.subr.bf16.mxu0 %v1012_v38 }
  0x11   :  { %914 = vmatpush3.bf16.msra.mxu0 %v1012_v38 }
  0x12   :  { %915 = vmatprep.subr.bf16.mxu0 %v1013_v39 }
  0x15   :  { %916 = vmatpush3.bf16.msra.mxu0 %v1013_v39 }
  0x16   :  { %917 = vmatprep.subr.bf16.mxu0 %v1014_v40 }
  0x19   :  { %918 = vmatpush3.bf16.msra.mxu0 %v1014_v40 }
  0x1a   :  { %919 = vmatprep.subr.bf16.mxu0 %v1015_v41 }
  0x1d   :  { %920 = vmatpush3.bf16.msra.mxu0 %v1015_v41 }
  0x1e   :  { %921 = vmatprep.subr.bf16.mxu0 %v1016_v42 }
  0x21   :  { %922 = vmatpush3.bf16.msra.mxu0 %v1016_v42 }
  0x22   :  { %947 = vmatprep.subr.bf16.mxu0 %v1065_v11 }
  0x93   :  { %v59_v16 = vpop.xlane.xlu1 %58 }
  0x94   :  { %v55_v15 = vpop.xlane.xlu0 %54  ;;  %v64_v18 = vmul.f32 0.03125, %v59_v16 }
  0x95   :  { %v62_v17 = vmul.f32 0.03125, %v55_v15 }
  0x96   :  { %v68_v21 = vsub.f32 %v52_v8, %v64_v18 }
  0x97   :  { %v66_v20 = vsub.f32 %v50_v7, %v62_v17  ;;  %v61_v23 = vpop.xlane.xlu1 %60  ;;  %v761_v7 = vld [vmem:[%s1333_s4] ss:$0 sm:$0xff] }
  0x98   :  { %v57_v22 = vpop.xlane.xlu0 %56  ;;  %v65_v25 = vmul.f32 0.03125, %v61_v23  ;;  %v1133_v27 = vmul.f32 %v759_v19, %v68_v21  ;;  %v1017_v21 = vld [vmem:[%s1334_s7 + $0x40] sm:$0xff]   ;;  %v1019_v23 = vld [vmem:[%s1334_s7 + $0x48] sm:$0xff]  }
  0x99   :  { %v63_v24 = vmul.f32 0.03125, %v57_v22  ;;  %v1131_v26 = vmul.f32 %v759_v19, %v66_v20  ;;  %v1018_v22 = vld [vmem:[%s1334_s7] sm:$0xff]   ;;  %928 = vmatpush3.bf16.msra.mxu1 %v1017_v21 }
  0x9a   :  { %v69_v29 = vsub.f32 %v53_v10, %v65_v25  ;;  %v76_v31 = vmul.f32 %v1133_v27, %v1133_v27  ;;  %929 = vmatprep.subr.bf16.mxu1 %v1065_v11  ;;  %v1021_v25 = vld [vmem:[%s1334_s7 + $0x50] sm:$0xff]  }
  0x9b   :  { %v67_v28 = vsub.f32 %v51_v9, %v63_v24  ;;  %v74_v30 = vmul.f32 %v1131_v26, %v1131_v26  ;;  %v1020_v24 = vld [vmem:[%s1334_s7 + $0x8] sm:$0xff]  }
  0x9c   :  { %v1141_v33 = vmul.f32 %v759_v19, %v69_v29  ;;  %v1025_v29 = vld [vmem:[%s1334_s7 + $0x60] sm:$0xff]  }
  0x9d   :  { %78 = vadd.xlane.f32.xlu0 %v74_v30  ;;  %v1139_v32 = vmul.f32 %v759_v19, %v67_v28  ;;  %930 = vmatpush3.bf16.msra.mxu1 %v1019_v23  ;;  %v1024_v28 = vld [vmem:[%s1334_s7 + $0x18] sm:$0xff]   ;;  %v1026_v30 = vld [vmem:[%s1334_s7 + $0x20] sm:$0xff]  }
  0x9e   :  { %v77_v35 = vmul.f32 %v1141_v33, %v1141_v33  ;;  %931 = vmatprep.subr.bf16.mxu1 %v1065_v11 }
  0x9f   :  { %v75_v34 = vmul.f32 %v1139_v32, %v1139_v32 }
  0xa1   :  { %82 = vadd.xlane.f32.xlu0 %v76_v31  ;;  %80 = vadd.xlane.f32.xlu1 %v75_v34  ;;  %v1027_v31 = vld [vmem:[%s1334_s7 + $0x68] sm:$0xff]   ;;  %v1030_v34 = vld [vmem:[%s1334_s7 + $0x30] sm:$0xff]  }
  0xa2   :  { %932 = vmatpush3.bf16.msra.mxu1 %v1021_v25  ;;  %v1034_v25 = vld [vmem:[%s1334_s7 + $0xc0] sm:$0xff]  }
  0xa3   :  { %933 = vmatprep.subr.bf16.mxu1 %v1065_v11 }
  0xa5   :  { %84 = vadd.xlane.f32.xlu1 %v77_v35  ;;  %v1031_v35 = vld [vmem:[%s1334_s7 + $0x78] sm:$0xff]  }
  0xb6   :  { %275 = vbcast.lane.b32.xlu1 %v273_v48, 256 }
  0xb7   :  { %268 = vbcast.lane.b32.xlu0 %v266_v49, 256 }
  0xba   :  { %254 = vbcast.lane.b32.xlu1 %v252_v50, 256 }
  0xbe   :  { %261 = vbcast.lane.b32.xlu1 %v259_v51, 256 }
 0x12a   :  { %v79_v52 = vpop.xlane.xlu0 %78 }
 0x12b   :  { %v86_v53 = vmul.f32 0.03125, %v79_v52 }
 0x12d   :  { %v90_v54 = vadd.f32 1e-06, %v86_v53 }
 0x12e   :  { %v81_v55 = vpop.xlane.xlu1 %80  ;;  %v83_v56 = vpop.xlane.xlu0 %82 }
 0x12f   :  { %1049 = vrsqrt.f32 %v90_v54  ;;  %v87_v57 = vmul.f32 0.03125, %v81_v55  ;;  %v88_v58 = vmul.f32 0.03125, %v83_v56 }
 0x131   :  { %v91_v59 = vadd.f32 1e-06, %v87_v57  ;;  %v92_v60 = vadd.f32 1e-06, %v88_v58 }
 0x132   :  { %v85_v61 = vpop.xlane.xlu1 %84  ;;  %v269_v48 = vpop.permute.xlu0 %268 }
 0x133   :  { %1051 = vrsqrt.f32 %v91_v59  ;;  %v89_v62 = vmul.f32 0.03125, %v85_v61 }
 0x134   :  { %1053 = vrsqrt.f32 %v92_v60 }
 0x135   :  { %v93_v63 = vadd.f32 1e-06, %v89_v62 }
 0x136   :  { %v276_v43 = vpop.permute.xlu1 %275 }
 0x137   :  { %1055 = vrsqrt.f32 %v93_v63 }
 0x139   :  { %v1050_v0 = vpop.eup %1049 }
 0x13a   :  { %v98_v1 = vmul.f32 %v1050_v0, %v1131_v26  ;;  %v1022_v26 = vld [vmem:[%s1334_s7 + $0x10] sm:$0xff]   ;;  %v255_v47 = vpop.permute.xlu1 %254 }
 0x13c   :  { %v108_v6 = vmul.f32 %v760_v2, %v98_v1 }
 0x13d   :  { %v1052_v3 = vpop.eup %1051 }
 0x13e   :  { %v1054_v4 = vpop.eup %1053  ;;  %v99_v5 = vmul.f32 %v1052_v3, %v1139_v32  ;;  %v118_v12 = vadd.f32 %v761_v7, %v108_v6  ;;  %v1028_v32 = vld [vmem:[%s1334_s7 + $0x28] sm:$0xff]   ;;  %v262_v52 = vpop.permute.xlu1 %261 }
 0x13f   :  { %v100_v8 = vmul.f32 %v1054_v4, %v1133_v27  ;;  %v1023_v27 = vld [vmem:[%s1334_s7 + $0x58] sm:$0xff]  }
 0x140   :  { %v109_v9 = vmul.f32 %v760_v2, %v99_v5  ;;  %934 = vmatpush3.bf16.msra.mxu1 %v1023_v27  ;;  %v1035_v27 = vld [vmem:[%s1334_s7 + $0x88] sm:$0xff]  }
 0x141   :  { %v1056_v10 = vpop.eup %1055  ;;  %v110_v15 = vmul.f32 %v760_v2, %v100_v8  ;;  %935 = vmatprep.subr.bf16.mxu1 %v1065_v11 }
 0x142   :  { %v119_v13 = vadd.f32 %v761_v7, %v109_v9  ;;  %v101_v14 = vmul.f32 %v1056_v10, %v1141_v33  ;;  %v1029_v33 = vld [vmem:[%s1334_s7 + $0x70] sm:$0xff]  }
 0x143   :  { %v120_v18 = vadd.f32 %v761_v7, %v110_v15 }
 0x144   :  { %v122_v16 = vpack.c.bf16 %v119_v13, %v118_v12  ;;  %v111_v17 = vmul.f32 %v760_v2, %v101_v14  ;;  %936 = vmatpush3.bf16.msra.mxu1 %v1025_v29  ;;  %v1037_v29 = vld [vmem:[%s1334_s7 + $0x90] sm:$0xff]  }
 0x145   :  { %937 = vmatprep.subr.bf16.mxu1 %v1065_v11 }
 0x146   :  { %923 = vmatprep.mubr.bf16.mxu0 %v122_v16  ;;  %v121_v19 = vadd.f32 %v761_v7, %v111_v17 }
 0x148   :  { %v123_v20 = vpack.c.bf16 %v121_v19, %v120_v18  ;;  %938 = vmatpush3.bf16.msra.mxu1 %v1027_v31  ;;  %v1039_v31 = vld [vmem:[%s1334_s7 + $0x98] sm:$0xff]  }
 0x149   :  { %939 = vmatprep.subr.bf16.mxu1 %v1065_v11 }
 0x14a   :  { %924 = vmatmul.mubr.bf16.vlgmr.msra.gmra.mrb[0].mxu0 %v123_v20 }
 0x14b   :  { %948 = vmatpush3.bf16.msra.mxu0 %v1018_v22  ;;  %963 = vmatprep.mubr.msk.bf16.mxu0 %vm1066_vm1, %v1065_v11  ;;  %v1033_v22 = vld [vmem:[%s1334_s7 + $0x80] sm:$0xff]  }
 0x14c   :  { %949 = vmatprep.subr.bf16.mxu0 %v1065_v11  ;;  %940 = vmatpush3.bf16.msra.mxu1 %v1029_v33  ;;  %v1041_v33 = vld [vmem:[%s1334_s7 + $0xa0] sm:$0xff]  }
 0x14d   :  { %941 = vmatprep.subr.bf16.mxu1 %v1065_v11 }
 0x14f   :  { %950 = vmatpush3.bf16.msra.mxu0 %v1020_v24 }
 0x150   :  { %951 = vmatprep.subr.bf16.mxu0 %v1065_v11  ;;  %942 = vmatpush3.bf16.msra.mxu1 %v1031_v35  ;;  %v1043_v35 = vld [vmem:[%s1334_s7 + $0xa8] sm:$0xff]  }
 0x151   :  { %967 = vmatprep.subr.bf16.mxu1 %v1065_v11 }
 0x153   :  { %952 = vmatpush3.bf16.msra.mxu0 %v1022_v26 }
 0x154   :  { %953 = vmatprep.subr.bf16.mxu0 %v1065_v11 }
 0x157   :  { %954 = vmatpush3.bf16.msra.mxu0 %v1024_v28  ;;  %v1036_v28 = vld [vmem:[%s1334_s7 + $0xc8] sm:$0xff]  }
 0x158   :  { %955 = vmatprep.subr.bf16.mxu0 %v1065_v11 }
 0x15b   :  { %956 = vmatpush3.bf16.msra.mxu0 %v1026_v30  ;;  %v1038_v30 = vld [vmem:[%s1334_s7 + $0xd0] sm:$0xff]  }
 0x15c   :  { %957 = vmatprep.subr.bf16.mxu0 %v1065_v11 }
 0x15f   :  { %958 = vmatpush3.bf16.msra.mxu0 %v1028_v32  ;;  %v1040_v32 = vld [vmem:[%s1334_s7 + $0xd8] sm:$0xff]  }
 0x160   :  { %959 = vmatprep.subr.bf16.mxu0 %v1065_v11 }
 0x163   :  { %960 = vmatpush3.bf16.msra.mxu0 %v1030_v34  ;;  %v1042_v34 = vld [vmem:[%s1334_s7 + $0xe0] sm:$0xff]  }
 0x164   :  { %961 = vmatprep.subr.bf16.mxu0 %v1065_v11 }
 0x167   :  { %962 = vmatpush3.bf16.msra.mxu0 %v1032_v36  ;;  %v1044_v36 = vld [vmem:[%s1334_s7 + $0xe8] sm:$0xff]  }
 0x168   :  { %987 = vmatprep.subr.bf16.mxu0 %v1065_v11 }
 0x21d   :  { %v925_v38 = vpop.f32.mrb[0].mxu0 }
 0x21e   :  { %v237_v39 = vadd.f32 %v925_v38, %v762_v37  ;;  %v228_v40 = vpop.f32.mrb[1].mxu0  ;;  %v1046_v38 = vld [vmem:[%s1334_s7 + $0xf0] sm:$0xff]  }
 0x21f   :  { %v229_v41 = vadd.f32 %v762_v37, %v228_v40  ;;  %v926_v42 = vpop.f32.mrb[2].mxu0  ;;  %v1047_v40 = vld [vmem:[%s1334_s7 + $0xb8] sm:$0xff]  }
 0x220   :  { %1057 = vtanh.f32 %v237_v39  ;;  %v240_v44 = vadd.f32 %v926_v42, %v762_v37  ;;  %v231_v45 = vpop.f32.mrb[3].mxu0 }
 0x221   :  { %1059 = vtanh.f32 %v229_v41  ;;  %v232_v46 = vadd.f32 %v762_v37, %v231_v45  ;;  %v1045_v37 = vld [vmem:[%s1334_s7 + $0xb0] sm:$0xff]   ;;  %v1048_v41 = vld [vmem:[%s1334_s7 + $0xf8] sm:$0xff]  }
 0x222   :  { %1061 = vtanh.f32 %v240_v44 }
 0x223   :  { %1063 = vtanh.f32 %v232_v46 }
 0x22a   :  { %v1058_v49 = vpop.eup %1057 }
 0x22b   :  { %v1060_v50 = vpop.eup %1059  ;;  %v279_v51 = vmul.f32 %v1058_v49, %v269_v48 }
 0x22c   :  { %v1062_v53 = vpop.eup %1061  ;;  %v277_v54 = vmul.f32 %v1060_v50, %v255_v47 }
 0x22d   :  { %v1064_v55 = vpop.eup %1063  ;;  %v280_v56 = vmul.f32 %v1062_v53, %v276_v43  ;;  %v293_v57 = vrot.slane %v279_v51, 4 }
 0x22e   :  { %v281_v58 = vrot.slane %v277_v54, 4  ;;  %v278_v59 = vmul.f32 %v1064_v55, %v262_v52 }
 0x22f   :  { %v299_v60 = vrot.slane %v280_v56, 4  ;;  %v294_v61 = vadd.f32 %v293_v57, %v279_v51 }
 0x230   :  { %v282_v62 = vadd.f32 %v281_v58, %v277_v54  ;;  %v287_v63 = vrot.slane %v278_v59, 4  ;;  %v851_v58 = vld [vmem:[%s1336_s8] ss:$0 sm:$0xff] }
 0x231   :  { %v300_v0 = vadd.f32 %v299_v60, %v280_v56  ;;  %v295_v1 = vrot.slane %v294_v61, 2 }
 0x232   :  { %v283_v2 = vrot.slane %v282_v62, 2  ;;  %v288_v3 = vadd.f32 %v287_v63, %v278_v59 }
 0x233   :  { %v301_v4 = vrot.slane %v300_v0, 2  ;;  %v296_v5 = vadd.f32 %v295_v1, %v294_v61 }
 0x234   :  { %v284_v6 = vadd.f32 %v283_v2, %v282_v62  ;;  %v289_v7 = vrot.slane %v288_v3, 2 }
 0x235   :  { %v302_v8 = vadd.f32 %v301_v4, %v300_v0  ;;  %v297_v9 = vrot.slane %v296_v5, 1 }
 0x236   :  { %v285_v10 = vrot.slane %v284_v6, 1  ;;  %v290_v12 = vadd.f32 %v289_v7, %v288_v3 }
 0x237   :  { %v303_v13 = vrot.slane %v302_v8, 1  ;;  %v298_v16 = vadd.f32 %v297_v9, %v296_v5 }
 0x238   :  { %v291_v14 = vrot.slane %v290_v12, 1  ;;  %v286_v17 = vadd.f32 %v285_v10, %v284_v6 }
 0x239   :  { %v304_v15 = vadd.f32 %v303_v13, %v302_v8 }
 0x23a   :  { %v292_v18 = vadd.f32 %v291_v14, %v290_v12 }
 0x23b   :  { %v311_v19 = vsel %vm309_vm2, %v304_v15, %v298_v16 }
 0x23c   :  { %315 = vst [vmem:[#allocation2 + $0x2] sm:$0x3] %v311_v19  ;;  %v310_v20 = vsel %vm309_vm2, %v292_v18, %v286_v17 }
 0x23d   :  { %314 = vst [vmem:[#allocation2] sm:$0x3] %v310_v20 }
 0x243   :  { %v317_v21 = vld [vmem:[#allocation2 + $0x2] sm:$0x3] }
 0x244   :  { %v338_v23 = vpack.c.bf16 %v317_v21, %v317_v21  ;;  %v316_v24 = vld [vmem:[#allocation2] sm:$0x3] }
 0x245   :  { %v321_v26 = vpack.c.bf16 %v316_v24, %v316_v24  ;;  %v318_v39 = vsub.f32 %v316_v24, %v317_v21  ;;  %v320_v43 = vmul.f32 %v317_v21, %v316_v24 }
 0x246   :  { %944 = vmatmul.mubr.bf16.vlgmr.msra.gmra.mrb[0].mxu1 %v338_v23 }
 0x247   :  { %968 = vmatpush3.bf16.msra.mxu1 %v1033_v22  ;;  %964 = vmatmul.mubr.bf16.vlgmr.msra.gmra.mrb[4].mxu0 %v321_v26  ;;  %v319_v42 = vand.u32 2147483647, %v318_v39  ;;  %v639_v45 = vpack.c.bf16 %v320_v43, %v320_v43 }
 0x248   :  { %988 = vmatpush3.bf16.msra.mxu0 %v1034_v25  ;;  %969 = vmatprep.subr.bf16.mxu1 %v1065_v11 }
 0x249   :  { %989 = vmatprep.subr.bf16.mxu0 %v1065_v11  ;;  %983 = vmatprep.mubr.msk.bf16.mxu1 %vm1066_vm1, %v1065_v11  ;;  %v532_v44 = vpack.c.bf16 %v319_v42, %v319_v42 }
 0x24a   :  { %1003 = vmatprep.mubr.msk.bf16.mxu0 %vm1066_vm1, %v1065_v11 }
 0x24b   :  { %970 = vmatpush3.bf16.msra.mxu1 %v1035_v27 }
 0x24c   :  { %990 = vmatpush3.bf16.msra.mxu0 %v1036_v28  ;;  %971 = vmatprep.subr.bf16.mxu1 %v1065_v11 }
 0x24d   :  { %991 = vmatprep.subr.bf16.mxu0 %v1065_v11 }
 0x24f   :  { %972 = vmatpush3.bf16.msra.mxu1 %v1037_v29 }
 0x250   :  { %992 = vmatpush3.bf16.msra.mxu0 %v1038_v30  ;;  %973 = vmatprep.subr.bf16.mxu1 %v1065_v11 }
 0x251   :  { %993 = vmatprep.subr.bf16.mxu0 %v1065_v11 }
 0x253   :  { %974 = vmatpush3.bf16.msra.mxu1 %v1039_v31 }
 0x254   :  { %994 = vmatpush3.bf16.msra.mxu0 %v1040_v32  ;;  %975 = vmatprep.subr.bf16.mxu1 %v1065_v11 }
 0x255   :  { %995 = vmatprep.subr.bf16.mxu0 %v1065_v11 }
 0x257   :  { %976 = vmatpush3.bf16.msra.mxu1 %v1041_v33 }
 0x258   :  { %996 = vmatpush3.bf16.msra.mxu0 %v1042_v34  ;;  %977 = vmatprep.subr.bf16.mxu1 %v1065_v11 }
 0x259   :  { %997 = vmatprep.subr.bf16.mxu0 %v1065_v11 }
 0x25b   :  { %978 = vmatpush3.bf16.msra.mxu1 %v1043_v35 }
 0x25c   :  { %998 = vmatpush3.bf16.msra.mxu0 %v1044_v36  ;;  %979 = vmatprep.subr.bf16.mxu1 %v1065_v11 }
 0x25d   :  { %999 = vmatprep.subr.bf16.mxu0 %v1065_v11 }
 0x25f   :  { %980 = vmatpush3.bf16.msra.mxu1 %v1045_v37 }
 0x260   :  { %1000 = vmatpush3.bf16.msra.mxu0 %v1046_v38  ;;  %981 = vmatprep.subr.bf16.mxu1 %v1065_v11 }
 0x261   :  { %1001 = vmatprep.subr.bf16.mxu0 %v1065_v11 }
 0x263   :  { %982 = vmatpush3.bf16.msra.mxu1 %v1047_v40 }
 0x264   :  { %1002 = vmatpush3.bf16.msra.mxu0 %v1048_v41 }
 0x266   :  { %984 = vmatmul.mubr.bf16.vlgmr.msra.gmra.mrb[4].mxu1 %v532_v44 }
 0x267   :  { %1004 = vmatmul.mubr.bf16.vlgmr.msra.gmra.mrb[8].mxu0 %v639_v45 }
 0x319   :  { %v438_v46 = vpop.f32.mrb[0].mxu1 }
 0x31a   :  { %v945_v47 = vpop.f32.mrb[1].mxu1  ;;  %v526_v48 = vpop.f32.mrb[4].mxu0 }
 0x31b   :  { %v527_v49 = vadd.f32 %v526_v48, %v438_v46  ;;  %v441_v50 = vpop.f32.mrb[2].mxu1  ;;  %v965_v51 = vpop.f32.mrb[5].mxu0 }
 0x31c   :  { %v946_v52 = vpop.f32.mrb[3].mxu1  ;;  %v529_v53 = vpop.f32.mrb[6].mxu0 }
 0x31d   :  { %v966_v54 = vpop.f32.mrb[7].mxu0 }
 0x339   :  { %v632_v55 = vpop.f32.mrb[4].mxu1 }
 0x33a   :  { %v638_v56 = vadd.f32 %v632_v55, %v527_v49  ;;  %v985_v57 = vpop.f32.mrb[5].mxu1  ;;  %v739_v11 = vpop.f32.mrb[8].mxu0 }
 0x33b   :  { %v635_v59 = vpop.f32.mrb[6].mxu1  ;;  %v1005_v60 = vpop.f32.mrb[9].mxu0 }
 0x33c   :  { %v745_v61 = vadd.f32 %v739_v11, %v638_v56  ;;  %v986_v62 = vpop.f32.mrb[7].mxu1  ;;  %v742_v63 = vpop.f32.mrb[10].mxu0 }
 0x33d   :  { %v1006_v0 = vpop.f32.mrb[11].mxu0 }
 0x33e   :  { %v753_v1 = vadd.f32 %v851_v58, %v745_v61 }
 0x340   :  { %754 = vst [vmem:[%s1337_s9] sm:$0x3] %v753_v1 }

</bundles_post_ra>
